<compile_context>
chip_gen: v7x
topology: tpu7x:2x2x1
jax: 0.10.0
libtpu: 0.0.40
codegen_flags: <defaults>
</compile_context>

<pallas_src>
import numpy as np
import jax
import jax.numpy as jnp
from jax.experimental import pallas as pl
from jax.experimental.pallas import tpu as pltpu

NEG = -1.0e30  # additive mask value for invalid / wrapped window positions


def slab_layout(E, C, O, Kmax, N):
    """Row offsets inside the packed parameter slab (all sections 8-row aligned)."""
    r8 = lambda v: -(-v // 8) * 8
    off, r = {}, 0
    off["w_in"] = r;   r += r8(E)            # (E, E)   fc_input weight
    off["w_conv"] = r; r += r8(Kmax * E)     # (Kmax*E, C) per-tap conv weights
    off["w_fc"] = r;   r += r8(C)            # (C, O)   fc weight
    off["b_in"] = r;   r += 8                # (1, E)
    off["b_conv"] = r; r += 8                # (1, C)
    off["b_fc"] = r;   r += 8                # (1, O)
    off["mask"] = r;   r += r8(N)            # (N, C) additive pool mask
    return off, r8(r), max(E, C, O)


def build_param_slab(params, filter_sizes, B, S):
    """Pack all weights/biases + pool mask into one f32 slab (host-side, built once)."""
    E = params["w_in"].shape[0]
    F = params["wc0"].shape[2]
    NF = len(filter_sizes)
    Kmax = max(filter_sizes)
    C = NF * F
    O = params["w_fc"].shape[1]
    N = B * S
    off, rows, width = slab_layout(E, C, O, Kmax, N)
    slab = np.zeros((rows, width), np.float32)

    slab[off["w_in"]:off["w_in"] + E, :E] = np.asarray(params["w_in"])
    slab[off["b_in"], :E] = np.asarray(params["b_in"])[0]

    for j, K in enumerate(filter_sizes):
        w = np.asarray(params[f"wc{j}"])                       # (K, E, F)
        for k in range(K):
            r0 = off["w_conv"] + k * E
            slab[r0:r0 + E, j * F:(j + 1) * F] = w[k]          # tap k of filter j
        slab[off["b_conv"], j * F:(j + 1) * F] = np.asarray(params[f"bc{j}"])[0]

    slab[off["w_fc"]:off["w_fc"] + C, :O] = np.asarray(params["w_fc"])
    slab[off["b_fc"], :O] = np.asarray(params["b_fc"])[0]

    # Additive pool mask: 0 where conv window is valid, NEG elsewhere (also kills
    # the wrapped / cross-batch rows produced by pltpu.roll).
    m = np.full((S, C), NEG, np.float32)
    for j, K in enumerate(filter_sizes):
        m[: S - K + 1, j * F:(j + 1) * F] = 0.0
    slab[off["mask"]:off["mask"] + N, :C] = np.tile(m, (B, 1))
    return jnp.asarray(slab)


def make_cnn_kernel(B, S, E, C, O, Kmax, off):
    N = B * S
    wi, wc, wf = off["w_in"], off["w_conv"], off["w_fc"]
    bi, bc, bf = off["b_in"], off["b_conv"], off["b_fc"]
    mk = off["mask"]

    def kernel(x_ref, slab_ref, out_ref):
        # ---- fc_input: (N, E) @ (E, E), bf16 operands, f32 accumulate ----
        w_in = slab_ref[wi:wi + E, :E].astype(jnp.bfloat16)
        b_in = slab_ref[bi:bi + 1, :E]
        emb = jnp.dot(x_ref[...].astype(jnp.bfloat16), w_in,
                      preferred_element_type=jnp.float32) + b_in          # (N, E) f32
        emb_bf = emb.astype(jnp.bfloat16)

        # ---- all 4 Conv1d's via per-tap accumulated dots ----
        # conv[i] = sum_k emb[i+k] @ W_k ; realized as roll(emb @ W_k, N-k) so the
        # roll (sublane XLU) runs on the (N, C) dot result, emb_bf is cast once.
        acc = jnp.zeros((N, C), jnp.float32)
        for k in range(Kmax):
            w_k = slab_ref[wc + k * E: wc + (k + 1) * E, :C].astype(jnp.bfloat16)
            r_k = jnp.dot(emb_bf, w_k, preferred_element_type=jnp.float32)
            acc = acc + (r_k if k == 0 else pltpu.roll(r_k, shift=N - k, axis=0))
        conv = acc + slab_ref[bc:bc + 1, :C]                               # (N, C)

        # ReLU, then additive -inf-style mask for padded / wrapped window rows.
        conved = jnp.maximum(conv, 0.0) + slab_ref[mk:mk + N, :C]          # (N, C)

        # Global max-pool over time, per batch, via static row slices (no reshape).
        pooled = jnp.concatenate(
            [jnp.max(conved[b * S:(b + 1) * S, :], axis=0, keepdims=True)
             for b in range(B)], axis=0)                                   # (B, C)

        # TODO(synk): nn.Dropout(p) is identity at inference; no RNG masking applied.
        w_fc = slab_ref[wf:wf + C, :O].astype(jnp.bfloat16)
        b_fc = slab_ref[bf:bf + 1, :O]
        out_ref[...] = (jnp.dot(pooled.astype(jnp.bfloat16), w_fc,
                                preferred_element_type=jnp.float32)
                        + b_fc).astype(out_ref.dtype)                      # (B, O)

    return kernel


def cnn_forward(x, slab, n_filters, filter_sizes, output_dim):
    B, S, E = x.shape
    C = len(filter_sizes) * n_filters
    Kmax = max(filter_sizes)
    N = B * S
    assert S >= Kmax, "sequence must cover the largest filter"
    off, rows, width = slab_layout(E, C, output_dim, Kmax, N)
    assert slab.shape == (rows, width)

    vmem = lambda: pl.BlockSpec(memory_space=pltpu.MemorySpace.VMEM)
    return pl.pallas_call(
        make_cnn_kernel(B, S, E, C, output_dim, Kmax, off),
        out_shape=jax.ShapeDtypeStruct((B, output_dim), jnp.float32),
        in_specs=[vmem(), vmem()],
        out_specs=vmem(),
    )(x.reshape(N, E), slab)


def ref_forward(x, params, filter_sizes):
    """Pure-JAX f32 reference mirroring the PyTorch forward (inference mode)."""
    emb = x @ params["w_in"] + params["b_in"]                              # (B, S, E)
    B, S, _ = emb.shape
    pooled = []
    for i, K in enumerate(filter_sizes):
        w = params[f"wc{i}"]                                               # (K, E, F)
        bc = params[f"bc{i}"]                                              # (1, F)
        L = S - K + 1
        acc = jnp.zeros((B, L, w.shape[2]), jnp.float32) + bc
        for k in range(K):
            acc = acc + jnp.einsum("ble,ef->blf", emb[:, k:k + L, :], w[k])
        pooled.append(jnp.max(jnp.maximum(acc, 0.0), axis=1))
    cat = jnp.concatenate(pooled, axis=1)
    return cat @ params["w_fc"] + params["b_fc"]


def init_params(key, E, F, filter_sizes, O):
    """Deterministic synthetic parameters (PyTorch-style uniform fan-in init)."""
    params = {}
    keys = jax.random.split(key, 2 + 2 * len(filter_sizes) + 2)
    ki = iter(range(len(keys)))

    s = 1.0 / jnp.sqrt(E)
    params["w_in"] = jax.random.uniform(keys[next(ki)], (E, E), jnp.float32, -s, s)
    params["b_in"] = jax.random.uniform(keys[next(ki)], (1, E), jnp.float32, -s, s)

    for i, K in enumerate(filter_sizes):
        s = 1.0 / jnp.sqrt(E * K)
        params[f"wc{i}"] = jax.random.uniform(keys[next(ki)], (K, E, F), jnp.float32, -s, s)
        params[f"bc{i}"] = jax.random.uniform(keys[next(ki)], (1, F), jnp.float32, -s, s)

    s = 1.0 / jnp.sqrt(len(filter_sizes) * F)
    params["w_fc"] = jax.random.uniform(keys[next(ki)], (len(filter_sizes) * F, O),
                                        jnp.float32, -s, s)
    params["b_fc"] = jax.random.uniform(keys[next(ki)], (1, O), jnp.float32, -s, s)
    return params


if __name__ == "__main__":
    # Small shapes consistent with the module's forward.
    B, S = 2, 16                 # batch, sequence length
    E = 32                       # embedding_dim
    F = 8                        # n_filters
    filter_sizes = (2, 3, 4, 5)  # filter_sizes
    O = 4                        # output_dim
    # dropout=0.5 and pad_idx are unused in the inference forward.

    key = jax.random.PRNGKey(0)
    k_x, k_p = jax.random.split(key)
    x = jax.random.normal(k_x, (B, S, E), jnp.float32)   # `encoded`
    params = init_params(k_p, E, F, filter_sizes, O)

    # Parameter slab is built once (host-side numpy) and reused across calls.
    slab = build_param_slab(params, filter_sizes, B, S)

    out = cnn_forward(x, slab, F, filter_sizes, O)
    out = jax.block_until_ready(out)

    ref = ref_forward(x, params, filter_sizes)
    assert out.shape == (B, O)
    # bf16 MXU operands vs an all-f32 reference -> loose-but-meaningful tolerance.
    assert jnp.allclose(out, ref, atol=5e-2, rtol=5e-2), (out, ref)
    print("KERNEL_OK")
</pallas_src>

<mosaic_0001>
module attributes {stable_mosaic.version = 11 : i64} {
  func.func @kernel(%arg0: memref<32x32xf32, #tpu.memory_space<vmem>>, %arg1: memref<280x32xf32, #tpu.memory_space<vmem>>, %arg2: memref<2x4xf32, #tpu.memory_space<vmem>>) attributes {dimension_semantics = [], scalar_prefetch = 0 : i64, scratch_operands = 0 : i64, tpu.core_type = #tpu.core_type<tc>} {
    %c0 = arith.constant 0 : index
    %c0_0 = arith.constant 0 : index
    %0 = vector.load %arg1[%c0, %c0_0] : memref<280x32xf32, #tpu.memory_space<vmem>>, vector<32x32xf32>
    %1 = arith.truncf %0 : vector<32x32xf32> to vector<32x32xbf16>
    %c224 = arith.constant 224 : index
    %c0_1 = arith.constant 0 : index
    %2 = vector.load %arg1[%c224, %c0_1] : memref<280x32xf32, #tpu.memory_space<vmem>>, vector<1x32xf32>
    %c0_2 = arith.constant 0 : index
    %c0_3 = arith.constant 0 : index
    %3 = vector.load %arg0[%c0_2, %c0_3] : memref<32x32xf32, #tpu.memory_space<vmem>>, vector<32x32xf32>
    %4 = arith.truncf %3 : vector<32x32xf32> to vector<32x32xbf16>
    %cst = arith.constant dense<0.000000e+00> : vector<32x32xf32>
    %5 = tpu.matmul %4, %1, %cst {dimension_numbers = #tpu.dot_dimension_numbers<[1], [0], [0], [1], [0, 0, 1, 1], [], []>} : vector<32x32xbf16>, vector<32x32xbf16>, vector<32x32xf32> -> vector<32x32xf32>
    %6 = vector.broadcast %2 : vector<1x32xf32> to vector<32x32xf32>
    %7 = arith.addf %5, %6 : vector<32x32xf32>
    %8 = arith.truncf %7 : vector<32x32xf32> to vector<32x32xbf16>
    %cst_4 = arith.constant 0.000000e+00 : f32
    %9 = vector.broadcast %cst_4 : f32 to vector<32x32xf32>
    %c32 = arith.constant 32 : index
    %c0_5 = arith.constant 0 : index
    %10 = vector.load %arg1[%c32, %c0_5] : memref<280x32xf32, #tpu.memory_space<vmem>>, vector<32x32xf32>
    %11 = arith.truncf %10 : vector<32x32xf32> to vector<32x32xbf16>
    %cst_6 = arith.constant dense<0.000000e+00> : vector<32x32xf32>
    %12 = tpu.matmul %8, %11, %cst_6 {dimension_numbers = #tpu.dot_dimension_numbers<[1], [0], [0], [1], [0, 0, 1, 1], [], []>} : vector<32x32xbf16>, vector<32x32xbf16>, vector<32x32xf32> -> vector<32x32xf32>
    %13 = arith.addf %9, %12 : vector<32x32xf32>
    %c64 = arith.constant 64 : index
    %c0_7 = arith.constant 0 : index
    %14 = vector.load %arg1[%c64, %c0_7] : memref<280x32xf32, #tpu.memory_space<vmem>>, vector<32x32xf32>
    %15 = arith.truncf %14 : vector<32x32xf32> to vector<32x32xbf16>
    %cst_8 = arith.constant dense<0.000000e+00> : vector<32x32xf32>
    %16 = tpu.matmul %8, %15, %cst_8 {dimension_numbers = #tpu.dot_dimension_numbers<[1], [0], [0], [1], [0, 0, 1, 1], [], []>} : vector<32x32xbf16>, vector<32x32xbf16>, vector<32x32xf32> -> vector<32x32xf32>
    %c31_i32 = arith.constant 31 : i32
    %17 = tpu.dynamic_rotate %16 by %c31_i32 dim 0 : vector<32x32xf32>, i32 -> vector<32x32xf32>
    %18 = arith.addf %13, %17 : vector<32x32xf32>
    %c96 = arith.constant 96 : index
    %c0_9 = arith.constant 0 : index
    %19 = vector.load %arg1[%c96, %c0_9] : memref<280x32xf32, #tpu.memory_space<vmem>>, vector<32x32xf32>
    %20 = arith.truncf %19 : vector<32x32xf32> to vector<32x32xbf16>
    %cst_10 = arith.constant dense<0.000000e+00> : vector<32x32xf32>
    %21 = tpu.matmul %8, %20, %cst_10 {dimension_numbers = #tpu.dot_dimension_numbers<[1], [0], [0], [1], [0, 0, 1, 1], [], []>} : vector<32x32xbf16>, vector<32x32xbf16>, vector<32x32xf32> -> vector<32x32xf32>
    %c30_i32 = arith.constant 30 : i32
    %22 = tpu.dynamic_rotate %21 by %c30_i32 dim 0 : vector<32x32xf32>, i32 -> vector<32x32xf32>
    %23 = arith.addf %18, %22 : vector<32x32xf32>
    %c128 = arith.constant 128 : index
    %c0_11 = arith.constant 0 : index
    %24 = vector.load %arg1[%c128, %c0_11] : memref<280x32xf32, #tpu.memory_space<vmem>>, vector<32x32xf32>
    %25 = arith.truncf %24 : vector<32x32xf32> to vector<32x32xbf16>
    %cst_12 = arith.constant dense<0.000000e+00> : vector<32x32xf32>
    %26 = tpu.matmul %8, %25, %cst_12 {dimension_numbers = #tpu.dot_dimension_numbers<[1], [0], [0], [1], [0, 0, 1, 1], [], []>} : vector<32x32xbf16>, vector<32x32xbf16>, vector<32x32xf32> -> vector<32x32xf32>
    %c29_i32 = arith.constant 29 : i32
    %27 = tpu.dynamic_rotate %26 by %c29_i32 dim 0 : vector<32x32xf32>, i32 -> vector<32x32xf32>
    %28 = arith.addf %23, %27 : vector<32x32xf32>
    %c160 = arith.constant 160 : index
    %c0_13 = arith.constant 0 : index
    %29 = vector.load %arg1[%c160, %c0_13] : memref<280x32xf32, #tpu.memory_space<vmem>>, vector<32x32xf32>
    %30 = arith.truncf %29 : vector<32x32xf32> to vector<32x32xbf16>
    %cst_14 = arith.constant dense<0.000000e+00> : vector<32x32xf32>
    %31 = tpu.matmul %8, %30, %cst_14 {dimension_numbers = #tpu.dot_dimension_numbers<[1], [0], [0], [1], [0, 0, 1, 1], [], []>} : vector<32x32xbf16>, vector<32x32xbf16>, vector<32x32xf32> -> vector<32x32xf32>
    %c28_i32 = arith.constant 28 : i32
    %32 = tpu.dynamic_rotate %31 by %c28_i32 dim 0 : vector<32x32xf32>, i32 -> vector<32x32xf32>
    %33 = arith.addf %28, %32 : vector<32x32xf32>
    %c232 = arith.constant 232 : index
    %c0_15 = arith.constant 0 : index
    %34 = vector.load %arg1[%c232, %c0_15] : memref<280x32xf32, #tpu.memory_space<vmem>>, vector<1x32xf32>
    %35 = vector.broadcast %34 : vector<1x32xf32> to vector<32x32xf32>
    %36 = arith.addf %33, %35 : vector<32x32xf32>
    %cst_16 = arith.constant 0.000000e+00 : f32
    %37 = vector.broadcast %cst_16 : f32 to vector<32x32xf32>
    %38 = arith.maximumf %36, %37 : vector<32x32xf32>
    %c248 = arith.constant 248 : index
    %c0_17 = arith.constant 0 : index
    %39 = vector.load %arg1[%c248, %c0_17] : memref<280x32xf32, #tpu.memory_space<vmem>>, vector<32x32xf32>
    %40 = arith.addf %38, %39 : vector<32x32xf32>
    %41 = vector.extract_strided_slice %40 {offsets = [0, 0], sizes = [16, 32], strides = [1, 1]} : vector<32x32xf32> to vector<16x32xf32>
    %cst_18 = arith.constant dense<0xFF800000> : vector<32xf32>
    %42 = vector.multi_reduction <maximumf>, %41, %cst_18 [0] : vector<16x32xf32> to vector<32xf32>
    %43 = vector.shape_cast %42 : vector<32xf32> to vector<1x32xf32>
    %44 = vector.extract_strided_slice %40 {offsets = [16, 0], sizes = [16, 32], strides = [1, 1]} : vector<32x32xf32> to vector<16x32xf32>
    %cst_19 = arith.constant dense<0xFF800000> : vector<32xf32>
    %45 = vector.multi_reduction <maximumf>, %44, %cst_19 [0] : vector<16x32xf32> to vector<32xf32>
    %46 = vector.shape_cast %45 : vector<32xf32> to vector<1x32xf32>
    %47 = tpu.concatenate %43, %46 in 0 : vector<1x32xf32>, vector<1x32xf32> -> vector<2x32xf32>
    %c192 = arith.constant 192 : index
    %c0_20 = arith.constant 0 : index
    %48 = vector.load %arg1[%c192, %c0_20] : memref<280x32xf32, #tpu.memory_space<vmem>>, vector<32x4xf32>
    %49 = arith.truncf %48 : vector<32x4xf32> to vector<32x4xbf16>
    %c240 = arith.constant 240 : index
    %c0_21 = arith.constant 0 : index
    %50 = vector.load %arg1[%c240, %c0_21] : memref<280x32xf32, #tpu.memory_space<vmem>>, vector<1x4xf32>
    %51 = arith.truncf %47 : vector<2x32xf32> to vector<2x32xbf16>
    %cst_22 = arith.constant dense<0.000000e+00> : vector<2x4xf32>
    %52 = tpu.matmul %51, %49, %cst_22 {dimension_numbers = #tpu.dot_dimension_numbers<[1], [0], [0], [1], [0, 0, 1, 1], [], []>} : vector<2x32xbf16>, vector<32x4xbf16>, vector<2x4xf32> -> vector<2x4xf32>
    %53 = vector.broadcast %50 : vector<1x4xf32> to vector<2x4xf32>
    %54 = arith.addf %52, %53 : vector<2x4xf32>
    %c0_23 = arith.constant 0 : index
    %c0_24 = arith.constant 0 : index
    %55 = vector.load %arg2[%c0_23, %c0_24] : memref<2x4xf32, #tpu.memory_space<vmem>>, vector<2x4xf32>
    tpu.vector_store %arg2[%c0_23, %c0_24], %54 {strides = array<i32>} : memref<2x4xf32, #tpu.memory_space<vmem>>, vector<2x4xf32>,
    return
  }
}

</mosaic_0001>

<bundles_post_ra>
// kernel: tpu_custom_call.1
= control target key start
LH: loop header
LB: loop body
LE: loop exit
PB: predicated region body
PF: predicated region fallthrough
CT: control target
= control target key end

     0   :  { %vm30_vm0 = vcmask 261120   ;;  %s843_s0 = inlined_call_operand.vmem [shape: f32[32,32], index: 0, kind: input, shape index: {}]   ;;  %s844_s1 = inlined_call_operand.vmem [shape: f32[280,32], index: 1, kind: input, shape index: {}]   ;;  %s845_s2 = inlined_call_operand.hbm [shape: f32[2,4], index: 2, kind: output, shape index: {}]  }
   0x1   :  { %v13_v0 = vld [vmem:[%s844_s1] sm:$0xff]  ;;  %v14_v1 = vld [vmem:[%s844_s1 + $0x8] sm:$0xff]  ;;  %v15_v2 = vld [vmem:[%s844_s1 + $0x10] sm:$0xff] }
   0x2   :  { %v17_v3 = vpack.c.bf16 %v14_v1, %v13_v0  ;;  %v16_v4 = vld [vmem:[%s844_s1 + $0x18] sm:$0xff]  ;;  %v20_v5 = vld [vmem:[%s843_s0] sm:$0xff]  ;;  %v21_v6 = vld [vmem:[%s843_s0 + $0x8] sm:$0xff] }
   0x3   :  { %v18_v7 = vpack.c.bf16 %v16_v4, %v15_v2  ;;  %v24_v8 = vpack.c.bf16 %v21_v6, %v20_v5 }
   0x4   :  { %7 = vsyncpa [#allocation3], 0  ;;  %574 = vmatprep.subr.bf16.mxu0 %v17_v3  ;;  %v22_v9 = vld [vmem:[%s843_s0 + $0x10] sm:$0xff]  ;;  %v23_v10 = vld [vmem:[%s843_s0 + $0x18] sm:$0xff]  ;;  %v657_v56 = vmov 0.0   ;;  %vm658_vm1 = vmmov 0   ;;  %v159_v60 = vlaneseq }
   0x5   :  { %575 = vmatpush3.bf16.msra.mxu0 %v17_v3  ;;  %578 = vmatprep.mubr.msk.bf16.mxu0 %vm30_vm0, %v24_v8  ;;  %v25_v11 = vpack.c.bf16 %v23_v10, %v22_v9  ;;  %v94_v12 = vld [vmem:[%s844_s1 + $0x40] sm:$0xff]  ;;  %v95_v13 = vld [vmem:[%s844_s1 + $0x48] sm:$0xff]  ;;  %v96_v18 = vld [vmem:[%s844_s1 + $0x50] sm:$0xff]  ;;  %vm458_vm6 = vcmask 1040384   ;;  %s659_s29 = smov [#allocation2]   ;;  %vm515_vm7 = vcmask 25600  }
   0x6   :  { %576 = vmatprep.subr.bf16.mxu0 %v18_v7  ;;  %v88_v14 = vld [vmem:[%s844_s1 + $0x20] sm:$0xff]  ;;  %v98_v15 = vpack.c.bf16 %v95_v13, %v94_v12  ;;  %v89_v16 = vld [vmem:[%s844_s1 + $0x28] sm:$0xff]  ;;  %v97_v19 = vld [vmem:[%s844_s1 + $0x58] sm:$0xff]  ;;  %v786_v61 = vshrl.u32 %v159_v60, 7  ;;  %s523_s30 = sshll.u32 %s659_s29, 4  ;;  %s524_s30 = int_to_ptr.vmem [resolvable:$true] %s523_s30 }
   0x7   :  { %v92_v17 = vpack.c.bf16 %v89_v16, %v88_v14  ;;  %v90_v20 = vld [vmem:[%s844_s1 + $0x30] sm:$0xff]  ;;  %v99_v21 = vpack.c.bf16 %v97_v19, %v96_v18  ;;  %v91_v22 = vld [vmem:[%s844_s1 + $0x38] sm:$0xff]  ;;  %v215_v24 = vld [vmem:[%s844_s1 + $0x60] sm:$0xff]  ;;  %s633_s3 = scalar_lea.vmem %s524_s30, 32  ;;  %p638_p1 = scmp.lt.s32.totalorder %s524_s30, %s524_s30 }
   0x8   :  { %582 = vmatprep.subr.bf16.mxu1 %v98_v15  ;;  %v93_v23 = vpack.c.bf16 %v91_v22, %v90_v20  ;;  %v216_v25 = vld [vmem:[%s844_s1 + $0x68] sm:$0xff]  ;;  %v283_v26 = vld [vmem:[%s844_s1 + $0x80] sm:$0xff]  ;;  %v217_v39 = vld [vmem:[%s844_s1 + $0x70] sm:$0xff]  ;;  %vm161_vm2 = vcmp.lt.s32.totalorder %v786_v61, 7  ;;  %vm274_vm3 = vcmp.lt.s32.totalorder %v786_v61, 6  ;;  %vm342_vm4 = vcmp.lt.s32.totalorder %v786_v61, 5  ;;  %p634_p0 = scmp.ne.s32.totalorder %s524_s30, %s633_s3  ;;  %p639_p2 = scmp.lt.s32.totalorder %s633_s3, %s633_s3 }
   0x9   :  { %577 = vmatpush3.bf16.msra.mxu0 %v18_v7  ;;  %583 = vmatpush3.bf16.msra.mxu1 %v98_v15  ;;  %v219_v27 = vpack.c.bf16 %v216_v25, %v215_v24  ;;  %v284_v28 = vld [vmem:[%s844_s1 + $0x88] sm:$0xff]  ;;  %v531_v31 = vld [vmem:[%s844_s1 + $0xe0] ss:$0 sm:$0xff]  ;;  %v218_v41 = vld [vmem:[%s844_s1 + $0x78] sm:$0xff]  ;;  %vm410_vm5 = vcmp.lt.s32.totalorder %v786_v61, 4 }
   0xa   :  { %590 = vmatprep.subr.bf16.mxu0 %v92_v17  ;;  %584 = vmatprep.subr.bf16.mxu1 %v99_v21  ;;  %v287_v29 = vpack.c.bf16 %v284_v28, %v283_v26  ;;  %v285_v42 = vld [vmem:[%s844_s1 + $0x90] sm:$0xff]  ;;  %v286_v43 = vld [vmem:[%s844_s1 + $0x98] sm:$0xff]  ;;  %v220_v45 = vpack.c.bf16 %v218_v41, %v217_v39  ;;  %v351_v47 = vld [vmem:[%s844_s1 + $0xa0] sm:$0xff]  ;;  %p640_p3 = por %p639_p2, %p638_p1 }
   0xb   :  { %v288_v46 = vpack.c.bf16 %v286_v43, %v285_v42  ;;  %v352_v48 = vld [vmem:[%s844_s1 + $0xa8] sm:$0xff]  ;;  %v353_v50 = vld [vmem:[%s844_s1 + $0xb0] sm:$0xff]  ;;  %v354_v51 = vld [vmem:[%s844_s1 + $0xb8] sm:$0xff] }
   0xc   :  { %579 = vmatmul.mubr.msk.bf16.vlgmr.msra.gmra.mrb[0].mxu0 %vm30_vm0, %v25_v11  ;;  %v355_v49 = vpack.c.bf16 %v352_v48, %v351_v47  ;;  %v356_v52 = vpack.c.bf16 %v354_v51, %v353_v50  ;;  %v460_v53 = vld [vmem:[%s844_s1 + $0xc0] sm:$0xff]  ;;  %v461_v54 = vld [vmem:[%s844_s1 + $0xc8] sm:$0xff]  ;;  %v462_v55 = vld [vmem:[%s844_s1 + $0xd0] sm:$0xff]  ;;  %p641_p4 = pnand %p640_p3, %p634_p0 }
   0xd   :  { %591 = vmatpush3.bf16.msra.mxu0 %v92_v17  ;;  %585 = vmatpush3.bf16.msra.mxu1 %v99_v21  ;;  %v464_v57 = vpack.c.bf16 %v461_v54, %v460_v53  ;;  %v463_v58 = vld [vmem:[%s844_s1 + $0xd8] sm:$0xff]  ;;  %v544_v60 = vld [vmem:[%s844_s1 + $0xe8] ss:$0 sm:$0xff] }
   0xe   :  { %592 = vmatprep.subr.bf16.mxu0 %v93_v23  ;;  %598 = vmatprep.subr.bf16.mxu1 %v219_v27  ;;  %v465_v59 = vpack.c.bf16 %v463_v58, %v462_v55  ;;  %v434_v61 = vld [vmem:[%s844_s1 + $0x108] sm:$0xff] }
  0x11   :  { %593 = vmatpush3.bf16.msra.mxu0 %v93_v23 }
  0x12   :  { %606 = vmatprep.subr.bf16.mxu0 %v287_v29 }
  0xdf   :  { %v580_v30 = vpop.f32.mrb[0].mxu0 }
  0xe0   :  { %v71_v32 = vpop.f32.mrb[1].mxu0  ;;  %v80_v34 = vadd.f32 %v580_v30, %v531_v31 }
  0xe1   :  { %v581_v33 = vpop.f32.mrb[2].mxu0  ;;  %v72_v37 = vadd.f32 %v531_v31, %v71_v32 }
  0xe2   :  { %v83_v35 = vadd.f32 %v581_v33, %v531_v31  ;;  %v74_v36 = vpop.f32.mrb[3].mxu0 }
  0xe3   :  { %v75_v38 = vadd.f32 %v531_v31, %v74_v36 }
  0xe4   :  { %v87_v40 = vpack.c.bf16 %v83_v35, %v80_v34 }
  0xe5   :  { %v86_v44 = vpack.c.bf16 %v75_v38, %v72_v37 }
  0xe7   :  { %586 = vmatprep.mubr.msk.bf16.mxu1 %vm30_vm0, %v86_v44  ;;  %594 = vmatprep.mubr.msk.bf16.mxu0 %vm30_vm0, %v86_v44 }
  0xe8   :  { %587 = vmatmul.mubr.msk.bf16.vlgmr.msra.gmra.mrb[0].mxu1 %vm30_vm0, %v87_v40  ;;  %595 = vmatmul.mubr.msk.bf16.vlgmr.msra.gmra.mrb[4].mxu0 %vm30_vm0, %v87_v40 }
  0xe9   :  { %599 = vmatpush3.bf16.msra.mxu1 %v219_v27  ;;  %602 = vmatprep.mubr.msk.bf16.mxu1 %vm30_vm0, %v86_v44 }
  0xea   :  { %607 = vmatpush3.bf16.msra.mxu0 %v287_v29  ;;  %610 = vmatprep.mubr.msk.bf16.mxu0 %vm30_vm0, %v86_v44 }
  0xeb   :  { %600 = vmatprep.subr.bf16.mxu1 %v220_v45  ;;  %608 = vmatprep.subr.bf16.mxu0 %v288_v46 }
  0xed   :  { %601 = vmatpush3.bf16.msra.mxu1 %v220_v45 }
  0xee   :  { %609 = vmatpush3.bf16.msra.mxu0 %v288_v46  ;;  %614 = vmatprep.subr.bf16.mxu1 %v355_v49 }
  0xef   :  { %622 = vmatprep.subr.bf16.mxu0 %v657_v56 }
  0xf0   :  { %603 = vmatmul.mubr.msk.bf16.vlgmr.msra.gmra.mrb[4].mxu1 %vm30_vm0, %v87_v40 }
  0xf1   :  { %611 = vmatmul.mubr.msk.bf16.vlgmr.msra.gmra.mrb[8].mxu0 %vm30_vm0, %v87_v40  ;;  %615 = vmatpush3.bf16.msra.mxu1 %v355_v49 }
  0xf2   :  { %618 = vmatprep.mubr.msk.bf16.mxu1 %vm30_vm0, %v86_v44  ;;  %616 = vmatprep.subr.bf16.mxu1 %v356_v52 }
  0xf3   :  { %626 = vmatprep.mubr.msk.bf16.mxu0 %vm658_vm1, %v657_v56  ;;  %623 = vmatpush3.bf16.msra.mxu0 %v464_v57 }
  0xf4   :  { %624 = vmatprep.subr.bf16.mxu0 %v657_v56 }
  0xf5   :  { %617 = vmatpush3.bf16.msra.mxu1 %v356_v52 }
  0xf7   :  { %625 = vmatpush3.bf16.msra.mxu0 %v465_v59 }
  0xf8   :  { %619 = vmatmul.mubr.msk.bf16.vlgmr.msra.gmra.mrb[8].mxu1 %vm30_vm0, %v87_v40 }
 0x1bb   :  { %v588_v62 = vpop.f32.mrb[0].mxu1  ;;  %v596_v63 = vpop.f32.mrb[4].mxu0 }
 0x1bc   :  { %v140_v0 = vpop.f32.mrb[1].mxu1  ;;  %v200_v1 = vpop.f32.mrb[5].mxu0  ;;  %v157_v5 = vrot.slane %v588_v62, 1 }
 0x1bd   :  { %v155_v2 = vrot.slane %v140_v0, 1  ;;  %v589_v3 = vpop.f32.mrb[2].mxu1  ;;  %v597_v4 = vpop.f32.mrb[6].mxu0 }
 0x1be   :  { %v158_v6 = vrot.slane %v589_v3, 1  ;;  %v143_v7 = vpop.f32.mrb[3].mxu1  ;;  %v203_v8 = vpop.f32.mrb[7].mxu0 }
 0x1bf   :  { %v156_v9 = vrot.slane %v143_v7, 1 }
 0x1c0   :  { %v162_v10 = vsel %vm161_vm2, %v157_v5, %v158_v6  ;;  %v165_v11 = vsel %vm161_vm2, %v158_v6, %v155_v2  ;;  %v435_v6 = vld [vmem:[%s844_s1 + $0x110] sm:$0xff] }
 0x1c1   :  { %v209_v12 = vadd.f32 %v596_v63, %v162_v10  ;;  %v212_v13 = vadd.f32 %v597_v4, %v165_v11  ;;  %v164_v14 = vsel %vm161_vm2, %v155_v2, %v156_v9  ;;  %v163_v15 = vsel %vm161_vm2, %v156_v9, %v157_v5  ;;  %v432_v11 = vld [vmem:[%s844_s1 + $0xf8] sm:$0xff] }
 0x1c2   :  { %v201_v16 = vadd.f32 %v200_v1, %v164_v14  ;;  %v204_v17 = vadd.f32 %v203_v8, %v163_v15 }
 0x1c3   :  { %v604_v18 = vpop.f32.mrb[4].mxu1 }
 0x1c4   :  { %v612_v19 = vpop.f32.mrb[8].mxu0  ;;  %v255_v20 = vpop.f32.mrb[5].mxu1  ;;  %v272_v24 = vrot.slane %v604_v18, 2 }
 0x1c5   :  { %v270_v21 = vrot.slane %v255_v20, 2  ;;  %v323_v22 = vpop.f32.mrb[9].mxu0  ;;  %v605_v23 = vpop.f32.mrb[6].mxu1  ;;  %v340_v29 = vrot.slane %v612_v19, 3 }
 0x1c6   :  { %v338_v25 = vrot.slane %v323_v22, 3  ;;  %v273_v26 = vrot.slane %v605_v23, 2  ;;  %v613_v27 = vpop.f32.mrb[10].mxu0  ;;  %v258_v28 = vpop.f32.mrb[7].mxu1 }
 0x1c7   :  { %v341_v30 = vrot.slane %v613_v27, 3  ;;  %v271_v31 = vrot.slane %v258_v28, 2  ;;  %v326_v32 = vpop.f32.mrb[11].mxu0 }
 0x1c8   :  { %v275_v33 = vsel %vm274_vm3, %v272_v24, %v273_v26  ;;  %v278_v34 = vsel %vm274_vm3, %v273_v26, %v270_v21  ;;  %v339_v35 = vrot.slane %v326_v32, 3 }
 0x1c9   :  { %v281_v36 = vadd.f32 %v275_v33, %v209_v12  ;;  %v282_v37 = vadd.f32 %v278_v34, %v212_v13  ;;  %v343_v38 = vsel %vm342_vm4, %v340_v29, %v341_v30  ;;  %v346_v39 = vsel %vm342_vm4, %v341_v30, %v338_v25  ;;  %v433_v12 = vld [vmem:[%s844_s1 + $0x100] sm:$0xff] }
 0x1ca   :  { %v276_v40 = vsel %vm274_vm3, %v271_v31, %v272_v24  ;;  %v277_v41 = vsel %vm274_vm3, %v270_v21, %v271_v31  ;;  %v344_v42 = vsel %vm342_vm4, %v339_v35, %v340_v29  ;;  %v345_v43 = vsel %vm342_vm4, %v338_v25, %v339_v35 }
 0x1cb   :  { %v349_v44 = vadd.f32 %v343_v38, %v281_v36  ;;  %v350_v45 = vadd.f32 %v346_v39, %v282_v37  ;;  %v279_v46 = vadd.f32 %v277_v41, %v201_v16  ;;  %v280_v47 = vadd.f32 %v276_v40, %v204_v17  ;;  %v620_v48 = vpop.f32.mrb[8].mxu1  ;;  %v545_v39 = vld [vmem:[%s844_s1 + $0xf0] ss:$0 sm:$0xff] }
 0x1cc   :  { %v391_v49 = vpop.f32.mrb[9].mxu1  ;;  %v408_v54 = vrot.slane %v620_v48, 4 }
 0x1cd   :  { %v347_v50 = vadd.f32 %v345_v43, %v279_v46  ;;  %v348_v51 = vadd.f32 %v344_v42, %v280_v47  ;;  %v406_v52 = vrot.slane %v391_v49, 4  ;;  %v621_v53 = vpop.f32.mrb[10].mxu1 }
 0x1ce   :  { %v409_v55 = vrot.slane %v621_v53, 4  ;;  %v394_v56 = vpop.f32.mrb[11].mxu1 }
 0x1cf   :  { %v407_v57 = vrot.slane %v394_v56, 4 }
 0x1d0   :  { %v411_v58 = vsel %vm410_vm5, %v408_v54, %v409_v55  ;;  %v414_v59 = vsel %vm410_vm5, %v409_v55, %v406_v52 }
 0x1d1   :  { %v417_v62 = vadd.f32 %v411_v58, %v349_v44  ;;  %v418_v63 = vadd.f32 %v414_v59, %v350_v45  ;;  %v412_v0 = vsel %vm410_vm5, %v407_v57, %v408_v54  ;;  %v413_v1 = vsel %vm410_vm5, %v406_v52, %v407_v57 }
 0x1d2   :  { %v415_v2 = vadd.f32 %v413_v1, %v347_v50  ;;  %v416_v3 = vadd.f32 %v412_v0, %v348_v51 }
 0x1d3   :  { %v426_v4 = vadd.f32 %v544_v60, %v417_v62  ;;  %v427_v5 = vadd.f32 %v544_v60, %v418_v63 }
 0x1d4   :  { %v424_v7 = vadd.f32 %v544_v60, %v415_v2  ;;  %v425_v8 = vadd.f32 %v544_v60, %v416_v3 }
 0x1d5   :  { %v430_v9 = vmax.f32 %v426_v4, 0.0  ;;  %v431_v10 = vmax.f32 %v427_v5, 0.0 }
 0x1d6   :  { %v428_v13 = vmax.f32 %v424_v7, 0.0  ;;  %v429_v14 = vmax.f32 %v425_v8, 0.0 }
 0x1d7   :  { %v438_v15 = vadd.f32 %v434_v61, %v430_v9  ;;  %v439_v16 = vadd.f32 %v435_v6, %v431_v10 }
 0x1d8   :  { %v436_v17 = vadd.f32 %v432_v11, %v428_v13  ;;  %v437_v18 = vadd.f32 %v433_v12, %v429_v14 }
 0x1d9   :  { %v449_v19 = vsel %vm30_vm0, %v438_v15, -inf  ;;  %v450_v20 = vsel %vm30_vm0, %v439_v16, -inf }
 0x1da   :  { %v451_v21 = vmax.f32 %v449_v19, %v450_v20  ;;  %v440_v22 = vsel %vm30_vm0, %v436_v17, -inf  ;;  %v441_v23 = vsel %vm30_vm0, %v437_v18, -inf }
 0x1db   :  { %v442_v24 = vmax.f32 %v440_v22, %v441_v23 }
 0x1dc   :  { %v452_v25 = vrot.slane %v451_v21, 4 }
 0x1dd   :  { %v443_v26 = vrot.slane %v442_v24, 4 }
 0x1de   :  { %v453_v27 = vmax.f32 %v451_v21, %v452_v25 }
 0x1df   :  { %v444_v28 = vmax.f32 %v442_v24, %v443_v26 }
 0x1e0   :  { %v454_v29 = vrot.slane %v453_v27, 2 }
 0x1e1   :  { %v445_v30 = vrot.slane %v444_v28, 2 }
 0x1e2   :  { %v455_v31 = vmax.f32 %v453_v27, %v454_v29 }
 0x1e3   :  { %v446_v32 = vmax.f32 %v444_v28, %v445_v30 }
 0x1e4   :  { %v456_v33 = vrot.slane %v455_v31, 1 }
 0x1e5   :  { %v447_v34 = vrot.slane %v446_v32, 1 }
 0x1e6   :  { %v457_v35 = vmax.f32 %v455_v31, %v456_v33 }
 0x1e7   :  { %v448_v36 = vmax.f32 %v446_v32, %v447_v34 }
 0x1e9   :  { %v459_v37 = vsel %vm458_vm6, %v448_v36, %v457_v35 }
 0x1ea   :  { %v467_v38 = vpack.c.bf16 %v459_v37, %v459_v37 }
 0x1ec   :  { %627 = vmatmul.mubr.msk.bf16.vlgmr.msra.gmra.mrb[12].mxu0 %vm30_vm0, %v467_v38 }
 0x2bf   :  { %v509_v40 = vpop.f32.mrb[12].mxu0 }
 0x2c0   :  { %v510_v41 = vadd.f32 %v545_v39, %v509_v40  ;;  %v628_v42 = vpop.f32.mrb[13].mxu0 }
 0x2c1   :  { %v512_v43 = vpop.f32.mrb[14].mxu0 }
 0x2c2   :  { %v629_v44 = vpop.f32.mrb[15].mxu0  ;;  %516 = vst.msk [vmem:[#allocation2] sm:$0x3] %vm515_vm7, %v510_v41 }
 0x2c3   :  { %644 = shalt.err (!%p641_p4)
}
 0x2c4   :  { %s645_s1 = scalar_lea.hbm %s845_s2, 32 }
 0x2c5   :  { %p646_p5 = scmp.ne.s32.totalorder %s845_s2, %s645_s1  ;;  %p649_p6 = scmp.lt.u32.totalorder %s645_s1, %s845_s2 }
 0x2c7   :  { %p651_p7 = pnand %p649_p6, %p646_p5 }
 0x2c9   :  { %654 = shalt.err (!%p651_p7)
}
 0x2ca   :  { %526 = dma.vmem_to_hbm [thread:$0]  %s524_s30, 32, %s845_s2, [#allocation3]  }
 0x2cb   :  { %655 = dma.done.wait [#allocation3], 32  }
 0x2cc   :  { %656 = vsyncadd [#allocation3], 4294967264 }
 0x2cd   :  { %530 = vsyncpa [#allocation3], 1 }

</bundles_post_ra>
